<compile_context>
chip_gen: v6e
topology: v6e:2x2x1
jax: 0.10.0
libtpu: 0.0.40
codegen_flags: <defaults>
</compile_context>

<pallas_src>
import jax
import jax.numpy as jnp
from jax import lax
from jax.experimental import pallas as pl
from jax.experimental.pallas import tpu as pltpu

# Contract the last axis of both operands: x[B, H] . w[O, H] -> [B, O]
# (keeps PyTorch [out_features, in_features] weight layout, no wrapper-side transpose).
_NT_DIMS = (((1,), (1,)), ((), ()))


def _regression_head_kernel(x_ref, w1_ref, b1_ref, w2_ref, b2_ref, o_ref):
    # dropout (eval) = identity
    x = x_ref[...]                                               # [B, H]
    h = lax.dot_general(x, w1_ref[...], dimension_numbers=_NT_DIMS,
                        preferred_element_type=jnp.float32)      # [B, H] (f32 acc)
    h = jnp.tanh(h + b1_ref[...])                                # f32 bias + tanh (EUP)
    # dropout (eval) = identity
    out = lax.dot_general(h, w2_ref[...], dimension_numbers=_NT_DIMS,
                          preferred_element_type=jnp.float32)    # [B, L] (f32 acc)
    o_ref[...] = (out + b2_ref[...]).astype(o_ref.dtype)


def regression_head(features, dense_w, dense_b, out_w, out_b, *, block_rows=1024):
    """features: [B, H]
       dense_w: [H, H]  (PyTorch layout [out, in]);  dense_b: [H]
       out_w:   [L, H]  (PyTorch layout [out, in]);  out_b:   [L]
    """
    B, H = features.shape
    L = out_w.shape[0]

    # Free (contiguous) reshapes so the kernel can broadcast the biases as rows.
    b1 = dense_b.reshape(1, H)
    b2 = out_b.reshape(1, L)

    out_shape = jax.ShapeDtypeStruct((B, L), features.dtype)

    if B <= block_rows:
        # Tiny/medium case: everything fits in VMEM with huge margin. Skip the grid,
        # index maps and double-buffering; hand whole-array VMEM refs to the kernel.
        return pl.pallas_call(
            _regression_head_kernel,
            out_shape=out_shape,
            in_specs=[pl.BlockSpec(memory_space=pltpu.MemorySpace.VMEM)] * 5,
            out_specs=pl.BlockSpec(memory_space=pltpu.MemorySpace.VMEM),
        )(features, dense_w, b1, out_w, b2)

    # Large-batch path: stream row tiles of `features`, keep weights/biases resident
    # (index_map always returns block (0, 0) for them, so they are DMA'd once).
    # "parallel" lets v7x's two TensorCores split the batch grid (no effect on v5e/v6e).
    tb = block_rows
    grid = (pl.cdiv(B, tb),)
    # NOTE: output last-dim L is narrow (< 128 lanes) -> masked stores per step. If this
    # path ever dominates, pad L to 128 in out_shape / out_w / out_b and slice in the
    # wrapper to get lane-dense unmasked vst.
    return pl.pallas_call(
        _regression_head_kernel,
        out_shape=out_shape,
        grid=grid,
        in_specs=[
            pl.BlockSpec((tb, H), lambda i: (i, 0)),   # x row tile (streamed)
            pl.BlockSpec((H, H), lambda i: (0, 0)),    # dense_w (resident)
            pl.BlockSpec((1, H), lambda i: (0, 0)),    # dense_b (resident)
            pl.BlockSpec((L, H), lambda i: (0, 0)),    # out_w   (resident)
            pl.BlockSpec((1, L), lambda i: (0, 0)),    # out_b   (resident)
        ],
        out_specs=pl.BlockSpec((tb, L), lambda i: (i, 0)),
        compiler_params=pltpu.CompilerParams(
            dimension_semantics=("parallel",),
        ),
    )(features, dense_w, b1, out_w, b2)


if __name__ == "__main__":
    # config: hidden_size=32, num_labels=4, final_dropout irrelevant at inference
    batch, hidden, num_labels = 8, 32, 4

    key = jax.random.PRNGKey(0)
    k_x, k_w1, k_b1, k_w2, k_b2 = jax.random.split(key, 5)

    features = jax.random.normal(k_x, (batch, hidden), dtype=jnp.float32)
    # PyTorch Linear layout: [out_features, in_features].
    dense_w = jax.random.normal(k_w1, (hidden, hidden), dtype=jnp.float32) * 0.05
    dense_b = jax.random.normal(k_b1, (hidden,), dtype=jnp.float32) * 0.05
    out_w = jax.random.normal(k_w2, (num_labels, hidden), dtype=jnp.float32) * 0.05
    out_b = jax.random.normal(k_b2, (num_labels,), dtype=jnp.float32) * 0.05

    out = regression_head(features, dense_w, dense_b, out_w, out_b)
    out = jax.block_until_ready(out)

    # Reference: same math as the PyTorch forward in eval mode.
    ref = jnp.tanh(features @ dense_w.T + dense_b) @ out_w.T + out_b
    assert out.shape == (batch, num_labels)
    assert jnp.allclose(out, ref, atol=1e-5, rtol=1e-5)

    print("KERNEL_OK")
</pallas_src>

<mosaic_0001>
module attributes {stable_mosaic.version = 11 : i64} {
  func.func @_regression_head_kernel(%arg0: memref<8x32xf32, #tpu.memory_space<vmem>>, %arg1: memref<32x32xf32, #tpu.memory_space<vmem>>, %arg2: memref<1x32xf32, #tpu.memory_space<vmem>>, %arg3: memref<4x32xf32, #tpu.memory_space<vmem>>, %arg4: memref<1x4xf32, #tpu.memory_space<vmem>>, %arg5: memref<8x4xf32, #tpu.memory_space<vmem>>) attributes {dimension_semantics = [], scalar_prefetch = 0 : i64, scratch_operands = 0 : i64, tpu.core_type = #tpu.core_type<tc>} {
    %c0 = arith.constant 0 : index
    %c0_0 = arith.constant 0 : index
    %0 = vector.load %arg0[%c0, %c0_0] : memref<8x32xf32, #tpu.memory_space<vmem>>, vector<8x32xf32>
    %c0_1 = arith.constant 0 : index
    %c0_2 = arith.constant 0 : index
    %1 = vector.load %arg1[%c0_1, %c0_2] : memref<32x32xf32, #tpu.memory_space<vmem>>, vector<32x32xf32>
    %cst = arith.constant dense<0.000000e+00> : vector<8x32xf32>
    %2 = tpu.matmul %0, %1, %cst {dimension_numbers = #tpu.dot_dimension_numbers<[1], [1], [0], [0], [0, 0, 1, 0], [], []>} : vector<8x32xf32>, vector<32x32xf32>, vector<8x32xf32> -> vector<8x32xf32>
    %c0_3 = arith.constant 0 : index
    %c0_4 = arith.constant 0 : index
    %3 = vector.load %arg2[%c0_3, %c0_4] : memref<1x32xf32, #tpu.memory_space<vmem>>, vector<1x32xf32>
    %4 = vector.broadcast %3 : vector<1x32xf32> to vector<8x32xf32>
    %5 = arith.addf %2, %4 : vector<8x32xf32>
    %6 = math.tanh %5 : vector<8x32xf32>
    %c0_5 = arith.constant 0 : index
    %c0_6 = arith.constant 0 : index
    %7 = vector.load %arg3[%c0_5, %c0_6] : memref<4x32xf32, #tpu.memory_space<vmem>>, vector<4x32xf32>
    %cst_7 = arith.constant dense<0.000000e+00> : vector<8x4xf32>
    %8 = tpu.matmul %6, %7, %cst_7 {dimension_numbers = #tpu.dot_dimension_numbers<[1], [1], [0], [0], [0, 0, 1, 0], [], []>} : vector<8x32xf32>, vector<4x32xf32>, vector<8x4xf32> -> vector<8x4xf32>
    %c0_8 = arith.constant 0 : index
    %c0_9 = arith.constant 0 : index
    %9 = vector.load %arg4[%c0_8, %c0_9] : memref<1x4xf32, #tpu.memory_space<vmem>>, vector<1x4xf32>
    %10 = vector.broadcast %9 : vector<1x4xf32> to vector<8x4xf32>
    %11 = arith.addf %8, %10 : vector<8x4xf32>
    %c0_10 = arith.constant 0 : index
    %c0_11 = arith.constant 0 : index
    %12 = vector.load %arg5[%c0_10, %c0_11] : memref<8x4xf32, #tpu.memory_space<vmem>>, vector<8x4xf32>
    tpu.vector_store %arg5[%c0_10, %c0_11], %11 {strides = array<i32>} : memref<8x4xf32, #tpu.memory_space<vmem>>, vector<8x4xf32>,
    return
  }
}

</mosaic_0001>

<bundles_post_ra>
// kernel: tpu_custom_call.1
= control target key start
LH: loop header
LB: loop body
LE: loop exit
PB: predicated region body
PF: predicated region fallthrough
CT: control target
= control target key end

     0   :  { %10 = vsyncpa [#allocation3], 0  ;;  %s382_s0 = inlined_call_operand.hbm [shape: f32[8,32], index: 0, kind: input, shape index: {}]   ;;  %s383_s1 = inlined_call_operand.hbm [shape: f32[32,32], index: 1, kind: input, shape index: {}]   ;;  %s384_s2 = inlined_call_operand.vmem [shape: f32[1,32], index: 2, kind: input, shape index: {}]   ;;  %s385_s3 = inlined_call_operand.vmem [shape: f32[4,32], index: 3, kind: input, shape index: {}]   ;;  %s386_s4 = inlined_call_operand.vmem [shape: f32[1,4], index: 4, kind: input, shape index: {}]   ;;  %s387_s5 = inlined_call_operand.vmem [shape: f32[8,4], index: 5, kind: output, shape index: {}]  }
   0x1   :  { %11 = vsyncpa [#allocation5], 0  ;;  %s321_s18 = smov [#allocation2]   ;;  %s322_s20 = smov [#allocation4]  }
   0x2   :  { %s18_s19 = sshll.u32 %s321_s18, 4  ;;  %s27_s21 = sshll.u32 %s322_s20, 4  ;;  %s19_s19 = int_to_ptr.vmem [resolvable:$true] %s18_s19  ;;  %s28_s21 = int_to_ptr.vmem [resolvable:$true] %s27_s21 }
   0x3   :  { %s285_s22 = scalar_lea.vmem %s19_s19, 128  ;;  %p290_p1 = scmp.lt.s32.totalorder %s19_s19, %s19_s19 }
   0x4   :  { %p286_p0 = scmp.ne.s32.totalorder %s19_s19, %s285_s22  ;;  %p291_p2 = scmp.lt.s32.totalorder %s285_s22, %s285_s22 }
   0x6   :  { %p292_p3 = por %p291_p2, %p290_p1 }
   0x8   :  { %p293_p4 = pnand %p292_p3, %p286_p0 }
   0xa   :  { %296 = shalt.err (!%p293_p4)
}
   0xb   :  { %21 = dma.hbm_to_vmem [thread:$0]  %s382_s0, 128, %s19_s19, [#allocation3]  }
   0xc   :  { %s305_s25 = scalar_lea.vmem %s28_s21, 512  ;;  %p310_p6 = scmp.lt.s32.totalorder %s28_s21, %s28_s21 }
   0xd   :  { %p306_p5 = scmp.ne.s32.totalorder %s28_s21, %s305_s25  ;;  %p311_p7 = scmp.lt.s32.totalorder %s305_s25, %s305_s25 }
   0xf   :  { %p312_p8 = por %p311_p7, %p310_p6 }
  0x11   :  { %p313_p9 = pnand %p312_p8, %p306_p5 }
  0x13   :  { %316 = shalt.err (!%p313_p9)
}
  0x14   :  { %s323_s26 = smov 128   ;;  %s324_s27 = smov 8  }
  0x15   :  { %33 = dma.hbm_to_vmem [thread:$0]  %s383_s1, 512, %s28_s21, [#allocation5], %s323_s26, %s323_s26, %s324_s27  }
  0x16   :  { %317 = dma.done.wait [#allocation3], 128  }
  0x17   :  { %318 = vsyncadd [#allocation3], 4294967168 }
  0x18   :  { %319 = dma.done.wait [#allocation5], 512  }
  0x19   :  { %320 = vsyncadd [#allocation5], 4294966784  ;;  %v325_v0 = vmov 0.0   ;;  %vm326_vm0 = vmmov 0   ;;  %vm58_vm1 = vcmask 261120   ;;  %v50_v1 = vld [vmem:[#allocation4 + $0x18] sm:$0xff] }
  0x1a   :  { %253 = vmatprep.subr.mxu0 %v325_v0  ;;  %261 = vmatprep.mubr.msk.f32.mxu0 %vm326_vm0, %v325_v0  ;;  %v49_v2 = vld [vmem:[#allocation4 + $0x10] sm:$0xff]  ;;  %v48_v3 = vld [vmem:[#allocation4 + $0x8] sm:$0xff]  ;;  %v47_v4 = vld [vmem:[#allocation4] sm:$0xff]  ;;  %vm229_vm2 = vcmask 31744  }
  0x1b   :  { %264 = vmatprep.subr.mxu1 %v325_v0  ;;  %266 = vmatprep.mubr.msk.f32.mxu1 %vm326_vm0, %v325_v0  ;;  %v46_v5 = vld [vmem:[#allocation2] sm:$0xff] }
  0x1c   :  { %254 = vmatpush3.xpose.msk.msra.mxu0 %vm58_vm1, %v50_v1  ;;  %v145_v6 = vld [vmem:[%s385_s3] sm:$0xf] }
  0x1d   :  { %255 = vmatprep.subr.mxu0 %v325_v0  ;;  %265 = vmatpush3.xpose.msk.msra.mxu1 %vm58_vm1, %v145_v6  ;;  %v237_v7 = vld [vmem:[%s384_s2] ss:$0 sm:$0xff] }
  0x1e   :  { %v243_v12 = vld [vmem:[%s386_s4] ss:$0 sm:$0xff] }
  0x20   :  { %256 = vmatpush3.xpose.msk.msra.mxu0 %vm58_vm1, %v49_v2 }
  0x21   :  { %257 = vmatprep.subr.mxu0 %v325_v0 }
  0x24   :  { %258 = vmatpush3.xpose.msk.msra.mxu0 %vm58_vm1, %v48_v3 }
  0x25   :  { %259 = vmatprep.subr.mxu0 %v325_v0 }
  0x28   :  { %260 = vmatpush3.xpose.msk.msra.mxu0 %vm58_vm1, %v47_v4 }
  0x2b   :  { %262 = vmatmul.mubr.msk.f32.vlgmr.msra.gmra.mxu0 %vm58_vm1, %v46_v5 }
  0xeb   :  { %v140_v8 = vpop.f32.mrf.mxu0 }
  0xec   :  { %v141_v9 = vadd.f32 %v237_v7, %v140_v8 }
  0xed   :  { %v263_v10 = vpop.f32.mrf.mxu0 }
  0xee   :  { %275 = vtanh.f32 %v141_v9 }
  0xfb   :  { %v276_v11 = vpop.eup %275 }
  0xfc   :  { %267 = vmatmul.mubr.msk.f32.vlgmr.msra.gmra.mxu1 %vm58_vm1, %v276_v11 }
 0x1bc   :  { %v225_v13 = vpop.f32.mrf.mxu1 }
 0x1bd   :  { %v226_v14 = vadd.f32 %v243_v12, %v225_v13 }
 0x1be   :  { %v268_v15 = vpop.f32.mrf.mxu1 }
 0x1bf   :  { %230 = vst.msk [vmem:[%s387_s5] sm:$0xff] %vm229_vm2, %v226_v14 }
 0x1c0   :  { %235 = vsyncpa [#allocation3], 1 }
 0x1c1   :  { %236 = vsyncpa [#allocation5], 1 }

</bundles_post_ra>
